<compile_context>
chip_gen: v6e
topology: v6e:2x2x1
jax: 0.10.0
libtpu: 0.0.40
codegen_flags: <defaults>
</compile_context>

<pallas_src>
import jax
import jax.numpy as jnp
from jax.experimental import pallas as pl
from jax.experimental.pallas import tpu as pltpu


def single_layer_kernel(x_ref, scale_ref, bias_ref, w_ref, cb_ref, o_ref):
    # x_ref:     (Bn, C, L)    input tile, Bn batch elements
    # scale_ref: (C, 1)        folded BN scale  (gamma / sqrt(var + eps))
    # bias_ref:  (C, 1)        folded BN bias   (beta - mean * scale)
    # w_ref:     (3, G, C)     conv weights per tap (tap k = w[g, c, k] in PyTorch OIH)
    # cb_ref:    (G, 1)        conv bias
    # o_ref:     (Bn, C+G, L)  output tile: [x ; conv_out] along channels
    Bn, C, L = x_ref.shape
    G = cb_ref.shape[0]

    scale = scale_ref[...]                       # (C, 1)
    bias = bias_ref[...]                         # (C, 1)
    cb = cb_ref[...]                             # (G, 1)
    w0 = w_ref[0]                                # (G, C)  tap at l-1
    w1 = w_ref[1]                                # (G, C)  tap at l
    w2 = w_ref[2]                                # (G, C)  tap at l+1
    zcol = jnp.zeros((G, 1), jnp.float32)        # zero boundary column (padding=1)

    # Static unroll over the Bn batch elements in this block (Bn kept small by wrapper).
    for b in range(Bn):
        xb = x_ref[b]                            # (C, L), f32

        # Passthrough channels: straight load -> store.
        o_ref[b, :C, :] = xb

        # Folded BatchNorm (training-mode batch stats) + ReLU, in f32.
        y = jnp.maximum(xb * scale + bias, 0.0)  # (C, L)
        y = y.astype(w0.dtype)                   # optional bf16 MXU inputs

        # Three K=C MXU dots on the unshifted activation; shift the (G, L) outputs.
        z0 = jnp.dot(w0, y, preferred_element_type=jnp.float32)   # contributes at l+1
        z1 = jnp.dot(w1, y, preferred_element_type=jnp.float32)   # contributes at l
        z2 = jnp.dot(w2, y, preferred_element_type=jnp.float32)   # contributes at l-1

        conv = (z1 + cb
                + jnp.concatenate([zcol, z0[:, :L - 1]], axis=1)   # z0[g, l-1], 0 at l=0
                + jnp.concatenate([z2[:, 1:], zcol], axis=1))      # z2[g, l+1], 0 at l=L-1

        o_ref[b, C:, :] = conv.astype(o_ref.dtype)


def _pick_batch_block(n, per_elem_bytes, budget_bytes=2 << 20, max_unroll=8):
    """Largest divisor of n (<= max_unroll) whose block stays under the byte budget."""
    best = 1
    for cand in range(1, min(n, max_unroll) + 1):
        if n % cand == 0 and cand * per_elem_bytes <= budget_bytes:
            best = cand
    return best


def single_layer_forward(x, gamma, beta, conv_w, conv_b, eps=1e-5,
                         mxu_input_dtype=jnp.float32):
    """x: (N, C, L) float32. conv_w: (G, C, 3) (PyTorch OIH), conv_b: (G,)."""
    N, C, L = x.shape
    G = conv_w.shape[0]

    # Alignment: keeps the concat boundary sublane-aligned and output stores lane-dense
    # (unaligned shapes work via full-array blocks but hit masked-store perf cliffs).
    assert C % 8 == 0 and G % 8 == 0, (C, G)
    assert L % 128 == 0, L

    # ---- glue: training-mode BatchNorm1d batch stats, one pass over x ----
    # var = E[x^2] - mean^2 (biased, matches PyTorch normalization). Guard tiny
    # negatives from cancellation. NOTE: for inputs with huge mean/std ratio a
    # shifted/Welford accumulation would be numerically safer.
    cnt = jnp.float32(N * L)
    s = jnp.sum(x, axis=(0, 2))
    ss = jnp.sum(x * x, axis=(0, 2))
    mean = s / cnt                                               # (C,)
    var = jnp.maximum(ss / cnt - mean * mean, 0.0)               # (C,)
    scale = gamma / jnp.sqrt(var + eps)                          # (C,)
    bias = beta - mean * scale                                   # (C,)
    scale2d = scale.reshape(C, 1).astype(jnp.float32)
    bias2d = bias.reshape(C, 1).astype(jnp.float32)

    # Per-tap weights: (G, C, 3) -> (3, G, C), one (G, C) matrix per tap.
    w_taps = jnp.transpose(conv_w, (2, 0, 1)).astype(mxu_input_dtype)
    cb2d = conv_b.reshape(G, 1).astype(jnp.float32)

    # Batch several elements per grid step so each step moves >= ~1 MiB.
    per_elem_bytes = (C + (C + G)) * L * 4       # input + output slab per batch element
    Bn = _pick_batch_block(N, per_elem_bytes)
    grid = (N // Bn,)

    out_shape = jax.ShapeDtypeStruct((N, C + G, L), x.dtype)

    return pl.pallas_call(
        single_layer_kernel,
        out_shape=out_shape,
        grid_spec=pltpu.PrefetchScalarGridSpec(
            num_scalar_prefetch=0,
            grid=grid,
            in_specs=[
                pl.BlockSpec((Bn, C, L), lambda n: (n, 0, 0)),
                pl.BlockSpec((C, 1), lambda n: (0, 0)),
                pl.BlockSpec((C, 1), lambda n: (0, 0)),
                pl.BlockSpec((3, G, C), lambda n: (0, 0, 0)),
                pl.BlockSpec((G, 1), lambda n: (0, 0)),
            ],
            out_specs=pl.BlockSpec((Bn, C + G, L), lambda n: (n, 0, 0)),
        ),
        compiler_params=pltpu.CompilerParams(
            # Batch-block axis is independent -> shards across TCs on v7x megacore.
            dimension_semantics=("parallel",)),
    )(x, scale2d, bias2d, w_taps, cb2d)


def single_layer_reference(x, gamma, beta, conv_w, conv_b, eps=1e-5):
    """Pure-JAX reference mirroring PyTorch training-mode forward."""
    mean = jnp.mean(x, axis=(0, 2), keepdims=True)
    var = jnp.mean((x - mean) ** 2, axis=(0, 2), keepdims=True)
    y = (x - mean) / jnp.sqrt(var + eps)
    y = y * gamma[None, :, None] + beta[None, :, None]
    y = jnp.maximum(y, 0.0)
    out = jax.lax.conv_general_dilated(
        y, conv_w, window_strides=(1,), padding=((1, 1),),
        dimension_numbers=("NCH", "OIH", "NCH"))
    out = out + conv_b[None, :, None]
    return jnp.concatenate([x, out], axis=1)


if __name__ == "__main__":
    N, C, G, L = 4, 8, 8, 128   # batch, nChannels, growthRate, sequence length

    key = jax.random.PRNGKey(0)
    kx, kw, kb = jax.random.split(key, 3)

    x = jax.random.normal(kx, (N, C, L), dtype=jnp.float32)

    # BatchNorm1d params (PyTorch default init: gamma=1, beta=0)
    gamma = jnp.ones((C,), dtype=jnp.float32)
    beta = jnp.zeros((C,), dtype=jnp.float32)

    # Conv1d(C, G, kernel_size=3) params, deterministic synthetic init
    fan_in = C * 3
    bound = 1.0 / jnp.sqrt(fan_in)
    conv_w = jax.random.uniform(kw, (G, C, 3), jnp.float32, -bound, bound)
    conv_b = jax.random.uniform(kb, (G,), jnp.float32, -bound, bound)

    out = single_layer_forward(x, gamma, beta, conv_w, conv_b)
    out = jax.block_until_ready(out)

    ref = single_layer_reference(x, gamma, beta, conv_w, conv_b)
    assert out.shape == (N, C + G, L), out.shape
    assert jnp.allclose(out, ref, atol=1e-3, rtol=1e-3), float(
        jnp.max(jnp.abs(out - ref)))

    print("KERNEL_OK")
</pallas_src>

<mosaic_0001>
module attributes {stable_mosaic.version = 11 : i64} {
  func.func @single_layer_kernel(%arg0: i32, %arg1: memref<4x8x128xf32, #tpu.memory_space<vmem>>, %arg2: memref<8x1xf32, #tpu.memory_space<vmem>>, %arg3: memref<8x1xf32, #tpu.memory_space<vmem>>, %arg4: memref<3x8x8xf32, #tpu.memory_space<vmem>>, %arg5: memref<8x1xf32, #tpu.memory_space<vmem>>, %arg6: memref<4x16x128xf32, #tpu.memory_space<vmem>>) attributes {dimension_semantics = [#tpu.dimension_semantics<parallel>], iteration_bounds = array<i64: 1>, scalar_prefetch = 0 : i64, scratch_operands = 0 : i64, tpu.core_type = #tpu.core_type<tc>, window_params = [{transform_indices = @transform_0, window_bounds = array<i64: 4, 8, 128>}, {pipeline_mode = #tpu.pipeline_mode<synchronous>, transform_indices = @transform_1, window_bounds = array<i64: 8, 1>}, {pipeline_mode = #tpu.pipeline_mode<synchronous>, transform_indices = @transform_2, window_bounds = array<i64: 8, 1>}, {pipeline_mode = #tpu.pipeline_mode<synchronous>, transform_indices = @transform_3, window_bounds = array<i64: 3, 8, 8>}, {pipeline_mode = #tpu.pipeline_mode<synchronous>, transform_indices = @transform_4, window_bounds = array<i64: 8, 1>}, {transform_indices = @transform_5, window_bounds = array<i64: 4, 16, 128>}]} {
    %c0 = arith.constant 0 : index
    %c0_0 = arith.constant 0 : index
    %0 = vector.load %arg2[%c0, %c0_0] : memref<8x1xf32, #tpu.memory_space<vmem>>, vector<8x1xf32>
    %c0_1 = arith.constant 0 : index
    %c0_2 = arith.constant 0 : index
    %1 = vector.load %arg3[%c0_1, %c0_2] : memref<8x1xf32, #tpu.memory_space<vmem>>, vector<8x1xf32>
    %c0_3 = arith.constant 0 : index
    %c0_4 = arith.constant 0 : index
    %2 = vector.load %arg5[%c0_3, %c0_4] : memref<8x1xf32, #tpu.memory_space<vmem>>, vector<8x1xf32>
    %c0_5 = arith.constant 0 : index
    %c0_6 = arith.constant 0 : index
    %c0_7 = arith.constant 0 : index
    %3 = vector.load %arg4[%c0_5, %c0_6, %c0_7] : memref<3x8x8xf32, #tpu.memory_space<vmem>>, vector<1x8x8xf32>
    %4 = vector.shape_cast %3 : vector<1x8x8xf32> to vector<8x8xf32>
    %c1 = arith.constant 1 : index
    %c0_8 = arith.constant 0 : index
    %c0_9 = arith.constant 0 : index
    %5 = vector.load %arg4[%c1, %c0_8, %c0_9] : memref<3x8x8xf32, #tpu.memory_space<vmem>>, vector<1x8x8xf32>
    %6 = vector.shape_cast %5 : vector<1x8x8xf32> to vector<8x8xf32>
    %c2 = arith.constant 2 : index
    %c0_10 = arith.constant 0 : index
    %c0_11 = arith.constant 0 : index
    %7 = vector.load %arg4[%c2, %c0_10, %c0_11] : memref<3x8x8xf32, #tpu.memory_space<vmem>>, vector<1x8x8xf32>
    %8 = vector.shape_cast %7 : vector<1x8x8xf32> to vector<8x8xf32>
    %cst = arith.constant 0.000000e+00 : f32
    %9 = vector.broadcast %cst : f32 to vector<8x1xf32>
    %c0_12 = arith.constant 0 : index
    %c0_13 = arith.constant 0 : index
    %c0_14 = arith.constant 0 : index
    %10 = vector.load %arg1[%c0_12, %c0_13, %c0_14] : memref<4x8x128xf32, #tpu.memory_space<vmem>>, vector<1x8x128xf32>
    %11 = vector.shape_cast %10 : vector<1x8x128xf32> to vector<8x128xf32>
    %c0_15 = arith.constant 0 : index
    %c0_16 = arith.constant 0 : index
    %c0_17 = arith.constant 0 : index
    %12 = vector.load %arg6[%c0_15, %c0_16, %c0_17] : memref<4x16x128xf32, #tpu.memory_space<vmem>>, vector<1x8x128xf32>
    %13 = vector.shape_cast %12 : vector<1x8x128xf32> to vector<8x128xf32>
    %14 = vector.shape_cast %11 : vector<8x128xf32> to vector<1x8x128xf32>
    tpu.vector_store %arg6[%c0_15, %c0_16, %c0_17], %14 {strides = array<i32>} : memref<4x16x128xf32, #tpu.memory_space<vmem>>, vector<1x8x128xf32>,
    %15 = vector.broadcast %0 : vector<8x1xf32> to vector<8x128xf32>
    %16 = arith.mulf %11, %15 : vector<8x128xf32>
    %17 = vector.broadcast %1 : vector<8x1xf32> to vector<8x128xf32>
    %18 = arith.addf %16, %17 : vector<8x128xf32>
    %cst_18 = arith.constant 0.000000e+00 : f32
    %19 = vector.broadcast %cst_18 : f32 to vector<8x128xf32>
    %20 = arith.maximumf %18, %19 : vector<8x128xf32>
    %cst_19 = arith.constant dense<0.000000e+00> : vector<8x128xf32>
    %21 = tpu.matmul %4, %20, %cst_19 {dimension_numbers = #tpu.dot_dimension_numbers<[1], [0], [0], [1], [0, 0, 1, 1], [], []>} : vector<8x8xf32>, vector<8x128xf32>, vector<8x128xf32> -> vector<8x128xf32>
    %cst_20 = arith.constant dense<0.000000e+00> : vector<8x128xf32>
    %22 = tpu.matmul %6, %20, %cst_20 {dimension_numbers = #tpu.dot_dimension_numbers<[1], [0], [0], [1], [0, 0, 1, 1], [], []>} : vector<8x8xf32>, vector<8x128xf32>, vector<8x128xf32> -> vector<8x128xf32>
    %cst_21 = arith.constant dense<0.000000e+00> : vector<8x128xf32>
    %23 = tpu.matmul %8, %20, %cst_21 {dimension_numbers = #tpu.dot_dimension_numbers<[1], [0], [0], [1], [0, 0, 1, 1], [], []>} : vector<8x8xf32>, vector<8x128xf32>, vector<8x128xf32> -> vector<8x128xf32>
    %24 = vector.broadcast %2 : vector<8x1xf32> to vector<8x128xf32>
    %25 = arith.addf %22, %24 : vector<8x128xf32>
    %26 = vector.extract_strided_slice %21 {offsets = [0, 0], sizes = [8, 127], strides = [1, 1]} : vector<8x128xf32> to vector<8x127xf32>
    %27 = tpu.concatenate %9, %26 in 1 : vector<8x1xf32>, vector<8x127xf32> -> vector<8x128xf32>
    %28 = arith.addf %25, %27 : vector<8x128xf32>
    %29 = vector.extract_strided_slice %23 {offsets = [0, 1], sizes = [8, 127], strides = [1, 1]} : vector<8x128xf32> to vector<8x127xf32>
    %30 = tpu.concatenate %29, %9 in 1 : vector<8x127xf32>, vector<8x1xf32> -> vector<8x128xf32>
    %31 = arith.addf %28, %30 : vector<8x128xf32>
    %c0_22 = arith.constant 0 : index
    %c8 = arith.constant 8 : index
    %c0_23 = arith.constant 0 : index
    %32 = vector.load %arg6[%c0_22, %c8, %c0_23] : memref<4x16x128xf32, #tpu.memory_space<vmem>>, vector<1x8x128xf32>
    %33 = vector.shape_cast %32 : vector<1x8x128xf32> to vector<8x128xf32>
    %34 = vector.shape_cast %31 : vector<8x128xf32> to vector<1x8x128xf32>
    tpu.vector_store %arg6[%c0_22, %c8, %c0_23], %34 {strides = array<i32>} : memref<4x16x128xf32, #tpu.memory_space<vmem>>, vector<1x8x128xf32>,
    %c1_24 = arith.constant 1 : index
    %c0_25 = arith.constant 0 : index
    %c0_26 = arith.constant 0 : index
    %35 = vector.load %arg1[%c1_24, %c0_25, %c0_26] : memref<4x8x128xf32, #tpu.memory_space<vmem>>, vector<1x8x128xf32>
    %36 = vector.shape_cast %35 : vector<1x8x128xf32> to vector<8x128xf32>
    %c1_27 = arith.constant 1 : index
    %c0_28 = arith.constant 0 : index
    %c0_29 = arith.constant 0 : index
    %37 = vector.load %arg6[%c1_27, %c0_28, %c0_29] : memref<4x16x128xf32, #tpu.memory_space<vmem>>, vector<1x8x128xf32>
    %38 = vector.shape_cast %37 : vector<1x8x128xf32> to vector<8x128xf32>
    %39 = vector.shape_cast %36 : vector<8x128xf32> to vector<1x8x128xf32>
    tpu.vector_store %arg6[%c1_27, %c0_28, %c0_29], %39 {strides = array<i32>} : memref<4x16x128xf32, #tpu.memory_space<vmem>>, vector<1x8x128xf32>,
    %40 = vector.broadcast %0 : vector<8x1xf32> to vector<8x128xf32>
    %41 = arith.mulf %36, %40 : vector<8x128xf32>
    %42 = vector.broadcast %1 : vector<8x1xf32> to vector<8x128xf32>
    %43 = arith.addf %41, %42 : vector<8x128xf32>
    %cst_30 = arith.constant 0.000000e+00 : f32
    %44 = vector.broadcast %cst_30 : f32 to vector<8x128xf32>
    %45 = arith.maximumf %43, %44 : vector<8x128xf32>
    %cst_31 = arith.constant dense<0.000000e+00> : vector<8x128xf32>
    %46 = tpu.matmul %4, %45, %cst_31 {dimension_numbers = #tpu.dot_dimension_numbers<[1], [0], [0], [1], [0, 0, 1, 1], [], []>} : vector<8x8xf32>, vector<8x128xf32>, vector<8x128xf32> -> vector<8x128xf32>
    %cst_32 = arith.constant dense<0.000000e+00> : vector<8x128xf32>
    %47 = tpu.matmul %6, %45, %cst_32 {dimension_numbers = #tpu.dot_dimension_numbers<[1], [0], [0], [1], [0, 0, 1, 1], [], []>} : vector<8x8xf32>, vector<8x128xf32>, vector<8x128xf32> -> vector<8x128xf32>
    %cst_33 = arith.constant dense<0.000000e+00> : vector<8x128xf32>
    %48 = tpu.matmul %8, %45, %cst_33 {dimension_numbers = #tpu.dot_dimension_numbers<[1], [0], [0], [1], [0, 0, 1, 1], [], []>} : vector<8x8xf32>, vector<8x128xf32>, vector<8x128xf32> -> vector<8x128xf32>
    %49 = vector.broadcast %2 : vector<8x1xf32> to vector<8x128xf32>
    %50 = arith.addf %47, %49 : vector<8x128xf32>
    %51 = vector.extract_strided_slice %46 {offsets = [0, 0], sizes = [8, 127], strides = [1, 1]} : vector<8x128xf32> to vector<8x127xf32>
    %52 = tpu.concatenate %9, %51 in 1 : vector<8x1xf32>, vector<8x127xf32> -> vector<8x128xf32>
    %53 = arith.addf %50, %52 : vector<8x128xf32>
    %54 = vector.extract_strided_slice %48 {offsets = [0, 1], sizes = [8, 127], strides = [1, 1]} : vector<8x128xf32> to vector<8x127xf32>
    %55 = tpu.concatenate %54, %9 in 1 : vector<8x127xf32>, vector<8x1xf32> -> vector<8x128xf32>
    %56 = arith.addf %53, %55 : vector<8x128xf32>
    %c1_34 = arith.constant 1 : index
    %c8_35 = arith.constant 8 : index
    %c0_36 = arith.constant 0 : index
    %57 = vector.load %arg6[%c1_34, %c8_35, %c0_36] : memref<4x16x128xf32, #tpu.memory_space<vmem>>, vector<1x8x128xf32>
    %58 = vector.shape_cast %57 : vector<1x8x128xf32> to vector<8x128xf32>
    %59 = vector.shape_cast %56 : vector<8x128xf32> to vector<1x8x128xf32>
    tpu.vector_store %arg6[%c1_34, %c8_35, %c0_36], %59 {strides = array<i32>} : memref<4x16x128xf32, #tpu.memory_space<vmem>>, vector<1x8x128xf32>,
    %c2_37 = arith.constant 2 : index
    %c0_38 = arith.constant 0 : index
    %c0_39 = arith.constant 0 : index
    %60 = vector.load %arg1[%c2_37, %c0_38, %c0_39] : memref<4x8x128xf32, #tpu.memory_space<vmem>>, vector<1x8x128xf32>
    %61 = vector.shape_cast %60 : vector<1x8x128xf32> to vector<8x128xf32>
    %c2_40 = arith.constant 2 : index
    %c0_41 = arith.constant 0 : index
    %c0_42 = arith.constant 0 : index
    %62 = vector.load %arg6[%c2_40, %c0_41, %c0_42] : memref<4x16x128xf32, #tpu.memory_space<vmem>>, vector<1x8x128xf32>
    %63 = vector.shape_cast %62 : vector<1x8x128xf32> to vector<8x128xf32>
    %64 = vector.shape_cast %61 : vector<8x128xf32> to vector<1x8x128xf32>
    tpu.vector_store %arg6[%c2_40, %c0_41, %c0_42], %64 {strides = array<i32>} : memref<4x16x128xf32, #tpu.memory_space<vmem>>, vector<1x8x128xf32>,
    %65 = vector.broadcast %0 : vector<8x1xf32> to vector<8x128xf32>
    %66 = arith.mulf %61, %65 : vector<8x128xf32>
    %67 = vector.broadcast %1 : vector<8x1xf32> to vector<8x128xf32>
    %68 = arith.addf %66, %67 : vector<8x128xf32>
    %cst_43 = arith.constant 0.000000e+00 : f32
    %69 = vector.broadcast %cst_43 : f32 to vector<8x128xf32>
    %70 = arith.maximumf %68, %69 : vector<8x128xf32>
    %cst_44 = arith.constant dense<0.000000e+00> : vector<8x128xf32>
    %71 = tpu.matmul %4, %70, %cst_44 {dimension_numbers = #tpu.dot_dimension_numbers<[1], [0], [0], [1], [0, 0, 1, 1], [], []>} : vector<8x8xf32>, vector<8x128xf32>, vector<8x128xf32> -> vector<8x128xf32>
    %cst_45 = arith.constant dense<0.000000e+00> : vector<8x128xf32>
    %72 = tpu.matmul %6, %70, %cst_45 {dimension_numbers = #tpu.dot_dimension_numbers<[1], [0], [0], [1], [0, 0, 1, 1], [], []>} : vector<8x8xf32>, vector<8x128xf32>, vector<8x128xf32> -> vector<8x128xf32>
    %cst_46 = arith.constant dense<0.000000e+00> : vector<8x128xf32>
    %73 = tpu.matmul %8, %70, %cst_46 {dimension_numbers = #tpu.dot_dimension_numbers<[1], [0], [0], [1], [0, 0, 1, 1], [], []>} : vector<8x8xf32>, vector<8x128xf32>, vector<8x128xf32> -> vector<8x128xf32>
    %74 = vector.broadcast %2 : vector<8x1xf32> to vector<8x128xf32>
    %75 = arith.addf %72, %74 : vector<8x128xf32>
    %76 = vector.extract_strided_slice %71 {offsets = [0, 0], sizes = [8, 127], strides = [1, 1]} : vector<8x128xf32> to vector<8x127xf32>
    %77 = tpu.concatenate %9, %76 in 1 : vector<8x1xf32>, vector<8x127xf32> -> vector<8x128xf32>
    %78 = arith.addf %75, %77 : vector<8x128xf32>
    %79 = vector.extract_strided_slice %73 {offsets = [0, 1], sizes = [8, 127], strides = [1, 1]} : vector<8x128xf32> to vector<8x127xf32>
    %80 = tpu.concatenate %79, %9 in 1 : vector<8x127xf32>, vector<8x1xf32> -> vector<8x128xf32>
    %81 = arith.addf %78, %80 : vector<8x128xf32>
    %c2_47 = arith.constant 2 : index
    %c8_48 = arith.constant 8 : index
    %c0_49 = arith.constant 0 : index
    %82 = vector.load %arg6[%c2_47, %c8_48, %c0_49] : memref<4x16x128xf32, #tpu.memory_space<vmem>>, vector<1x8x128xf32>
    %83 = vector.shape_cast %82 : vector<1x8x128xf32> to vector<8x128xf32>
    %84 = vector.shape_cast %81 : vector<8x128xf32> to vector<1x8x128xf32>
    tpu.vector_store %arg6[%c2_47, %c8_48, %c0_49], %84 {strides = array<i32>} : memref<4x16x128xf32, #tpu.memory_space<vmem>>, vector<1x8x128xf32>,
    %c3 = arith.constant 3 : index
    %c0_50 = arith.constant 0 : index
    %c0_51 = arith.constant 0 : index
    %85 = vector.load %arg1[%c3, %c0_50, %c0_51] : memref<4x8x128xf32, #tpu.memory_space<vmem>>, vector<1x8x128xf32>
    %86 = vector.shape_cast %85 : vector<1x8x128xf32> to vector<8x128xf32>
    %c3_52 = arith.constant 3 : index
    %c0_53 = arith.constant 0 : index
    %c0_54 = arith.constant 0 : index
    %87 = vector.load %arg6[%c3_52, %c0_53, %c0_54] : memref<4x16x128xf32, #tpu.memory_space<vmem>>, vector<1x8x128xf32>
    %88 = vector.shape_cast %87 : vector<1x8x128xf32> to vector<8x128xf32>
    %89 = vector.shape_cast %86 : vector<8x128xf32> to vector<1x8x128xf32>
    tpu.vector_store %arg6[%c3_52, %c0_53, %c0_54], %89 {strides = array<i32>} : memref<4x16x128xf32, #tpu.memory_space<vmem>>, vector<1x8x128xf32>,
    %90 = vector.broadcast %0 : vector<8x1xf32> to vector<8x128xf32>
    %91 = arith.mulf %86, %90 : vector<8x128xf32>
    %92 = vector.broadcast %1 : vector<8x1xf32> to vector<8x128xf32>
    %93 = arith.addf %91, %92 : vector<8x128xf32>
    %cst_55 = arith.constant 0.000000e+00 : f32
    %94 = vector.broadcast %cst_55 : f32 to vector<8x128xf32>
    %95 = arith.maximumf %93, %94 : vector<8x128xf32>
    %cst_56 = arith.constant dense<0.000000e+00> : vector<8x128xf32>
    %96 = tpu.matmul %4, %95, %cst_56 {dimension_numbers = #tpu.dot_dimension_numbers<[1], [0], [0], [1], [0, 0, 1, 1], [], []>} : vector<8x8xf32>, vector<8x128xf32>, vector<8x128xf32> -> vector<8x128xf32>
    %cst_57 = arith.constant dense<0.000000e+00> : vector<8x128xf32>
    %97 = tpu.matmul %6, %95, %cst_57 {dimension_numbers = #tpu.dot_dimension_numbers<[1], [0], [0], [1], [0, 0, 1, 1], [], []>} : vector<8x8xf32>, vector<8x128xf32>, vector<8x128xf32> -> vector<8x128xf32>
    %cst_58 = arith.constant dense<0.000000e+00> : vector<8x128xf32>
    %98 = tpu.matmul %8, %95, %cst_58 {dimension_numbers = #tpu.dot_dimension_numbers<[1], [0], [0], [1], [0, 0, 1, 1], [], []>} : vector<8x8xf32>, vector<8x128xf32>, vector<8x128xf32> -> vector<8x128xf32>
    %99 = vector.broadcast %2 : vector<8x1xf32> to vector<8x128xf32>
    %100 = arith.addf %97, %99 : vector<8x128xf32>
    %101 = vector.extract_strided_slice %96 {offsets = [0, 0], sizes = [8, 127], strides = [1, 1]} : vector<8x128xf32> to vector<8x127xf32>
    %102 = tpu.concatenate %9, %101 in 1 : vector<8x1xf32>, vector<8x127xf32> -> vector<8x128xf32>
    %103 = arith.addf %100, %102 : vector<8x128xf32>
    %104 = vector.extract_strided_slice %98 {offsets = [0, 1], sizes = [8, 127], strides = [1, 1]} : vector<8x128xf32> to vector<8x127xf32>
    %105 = tpu.concatenate %104, %9 in 1 : vector<8x127xf32>, vector<8x1xf32> -> vector<8x128xf32>
    %106 = arith.addf %103, %105 : vector<8x128xf32>
    %c3_59 = arith.constant 3 : index
    %c8_60 = arith.constant 8 : index
    %c0_61 = arith.constant 0 : index
    %107 = vector.load %arg6[%c3_59, %c8_60, %c0_61] : memref<4x16x128xf32, #tpu.memory_space<vmem>>, vector<1x8x128xf32>
    %108 = vector.shape_cast %107 : vector<1x8x128xf32> to vector<8x128xf32>
    %109 = vector.shape_cast %106 : vector<8x128xf32> to vector<1x8x128xf32>
    tpu.vector_store %arg6[%c3_59, %c8_60, %c0_61], %109 {strides = array<i32>} : memref<4x16x128xf32, #tpu.memory_space<vmem>>, vector<1x8x128xf32>,
    return
  }
  func.func @transform_0(%arg0: i32) -> (i32, i32, i32) {
    %c0_i32 = arith.constant 0 : i32
    %c0_i32_0 = arith.constant 0 : i32
    %c0_i32_1 = arith.constant 0 : i32
    return %arg0, %c0_i32, %c0_i32_0 : i32, i32, i32
  }
  func.func @transform_1(%arg0: i32) -> (i32, i32) {
    %c0_i32 = arith.constant 0 : i32
    %c0_i32_0 = arith.constant 0 : i32
    %c0_i32_1 = arith.constant 0 : i32
    return %c0_i32, %c0_i32_0 : i32, i32
  }
  func.func @transform_2(%arg0: i32) -> (i32, i32) {
    %c0_i32 = arith.constant 0 : i32
    %c0_i32_0 = arith.constant 0 : i32
    %c0_i32_1 = arith.constant 0 : i32
    return %c0_i32, %c0_i32_0 : i32, i32
  }
  func.func @transform_3(%arg0: i32) -> (i32, i32, i32) {
    %c0_i32 = arith.constant 0 : i32
    %c0_i32_0 = arith.constant 0 : i32
    %c0_i32_1 = arith.constant 0 : i32
    %c0_i32_2 = arith.constant 0 : i32
    return %c0_i32, %c0_i32_0, %c0_i32_1 : i32, i32, i32
  }
  func.func @transform_4(%arg0: i32) -> (i32, i32) {
    %c0_i32 = arith.constant 0 : i32
    %c0_i32_0 = arith.constant 0 : i32
    %c0_i32_1 = arith.constant 0 : i32
    return %c0_i32, %c0_i32_0 : i32, i32
  }
  func.func @transform_5(%arg0: i32) -> (i32, i32, i32) {
    %c0_i32 = arith.constant 0 : i32
    %c0_i32_0 = arith.constant 0 : i32
    %c0_i32_1 = arith.constant 0 : i32
    return %arg0, %c0_i32, %c0_i32_0 : i32, i32, i32
  }
}

</mosaic_0001>

<bundles_post_ra>
// kernel: tpu_custom_call.1
= control target key start
LH: loop header
LB: loop body
LE: loop exit
PB: predicated region body
PF: predicated region fallthrough
CT: control target
= control target key end

     0   :  { %10 = vsyncpa [#allocation3], 0  ;;  %s1283_s0 = inlined_call_operand.hbm [shape: f32[4,8,128], index: 0, kind: input, shape index: {}]   ;;  %s1284_s1 = inlined_call_operand.vmem [shape: f32[8,1], index: 1, kind: input, shape index: {}]   ;;  %s1285_s2 = inlined_call_operand.vmem [shape: f32[8,1], index: 2, kind: input, shape index: {}]   ;;  %s1286_s3 = inlined_call_operand.vmem [shape: f32[3,8,8], index: 3, kind: input, shape index: {}]   ;;  %s1287_s4 = inlined_call_operand.vmem [shape: f32[8,1], index: 4, kind: input, shape index: {}]   ;;  %s1288_s5 = inlined_call_operand.hbm [shape: f32[4,16,128], index: 5, kind: output, shape index: {}]  }
   0x1   :  { %11 = vsyncpa [#allocation4], 0  ;;  %s1158_s18 = smov [#allocation2]  }
   0x2   :  { %s17_s19 = sshll.u32 %s1158_s18, 4  ;;  %s18_s19 = int_to_ptr.vmem [resolvable:$true] %s17_s19 }
   0x3   :  { %s1122_s20 = scalar_lea.vmem %s18_s19, 512  ;;  %p1127_p1 = scmp.lt.s32.totalorder %s18_s19, %s18_s19 }
   0x4   :  { %p1123_p0 = scmp.ne.s32.totalorder %s18_s19, %s1122_s20  ;;  %p1128_p2 = scmp.lt.s32.totalorder %s1122_s20, %s1122_s20 }
   0x6   :  { %p1129_p3 = por %p1128_p2, %p1127_p1 }
   0x8   :  { %p1130_p4 = pnand %p1129_p3, %p1123_p0 }
   0xa   :  { %1133 = shalt.err (!%p1130_p4)
}
   0xb   :  { %s1159_s21 = smov 128   ;;  %s1160_s22 = smov 8  }
   0xc   :  { %23 = dma.hbm_to_vmem [thread:$0]  %s1283_s0, 512, %s18_s19, [#allocation3], %s1159_s21, %s1159_s21, %s1160_s22  }
   0xd   :  { %1154 = dma.done.wait [#allocation3], 512  }
   0xe   :  { %1155 = vsyncadd [#allocation3], 4294966784  ;;  %v1161_v0 = vmov 0   ;;  %v35_v1 = vld [vmem:[%s1284_s1] sm:$0xff]  ;;  %v299_v3 = vld [vmem:[#allocation2 + $0x8] sm:$0xff]  ;;  %v1162_v7 = vmov 0.0  }
   0xf   :  { %1112 = vset.pattern.permute.xlu0 %v1161_v0  ;;  %1113 = vset.pattern.permute.xlu1 %v1161_v0  ;;  %v43_v2 = vld [vmem:[#allocation2] sm:$0xff]  ;;  %v529_v4 = vld [vmem:[#allocation2 + $0x10] sm:$0xff]  ;;  %v759_v5 = vld [vmem:[#allocation2 + $0x18] sm:$0xff]  ;;  %301 = vst [vmem:[#allocation5 + $0x10] sm:$0xff] %v299_v3  ;;  %vm1163_vm0 = vmmov 0   ;;  %vm58_vm1 = vcmask 64512  }
  0x10   :  { %47 = vperm.xlu0 %1112, %v35_v1   ;;  %44 = vst [vmem:[#allocation5] sm:$0xff] %v43_v2  ;;  %v36_v6 = vld [vmem:[%s1285_s2] sm:$0xff]  ;;  %531 = vst [vmem:[#allocation5 + $0x20] sm:$0xff] %v529_v4  ;;  %1043 = vmatprep.subr.mxu0 %v1162_v7  ;;  %v1006_v17 = vld [vmem:[%s1286_s3 + $0x10] sm:$0xff]  ;;  %s1165_s8 = smov 127   ;;  %vm287_vm2 = vcmask 7168  }
  0x11   :  { %761 = vst [vmem:[#allocation5 + $0x30] sm:$0xff] %v759_v5  ;;  %1048 = vmatprep.subr.mxu1 %v1162_v7  ;;  %1045 = vmatprep.mubr.msk.f32.mxu0 %vm1163_vm0, %v1162_v7  ;;  %v37_v8 = vld [vmem:[%s1287_s4] sm:$0xff]  ;;  %v1005_v20 = vld [vmem:[%s1286_s3 + $0x8] sm:$0xff]  ;;  %vm294_vm3 = vcmask 1039360   ;;  %s1166_s9 = smov [#allocation5]  }
  0x12   :  { %1050 = vmatprep.mubr.msk.f32.mxu1 %vm1163_vm0, %v1162_v7  ;;  %207 = vperm.xlu1 %1113, %v37_v8   ;;  %v38_v16 = vld [vmem:[%s1286_s3] sm:$0xff]  ;;  %s1164_s3 = smov 1   ;;  %s993_s10 = sshll.u32 %s1166_s9, 4  ;;  %s994_s10 = int_to_ptr.vmem [resolvable:$true] %s993_s10 }
  0x13   :  { %s1134_s11 = scalar_lea.vmem %s994_s10, 1024  ;;  %p1139_p6 = scmp.lt.s32.totalorder %s994_s10, %s994_s10 }
  0x14   :  { %53 = vperm.xlu0 %1112, %v36_v6   ;;  %p1135_p5 = scmp.ne.s32.totalorder %s994_s10, %s1134_s11  ;;  %p1140_p7 = scmp.lt.s32.totalorder %s1134_s11, %s1134_s11 }
  0x16   :  { %p1141_p8 = por %p1140_p7, %p1139_p6 }
  0x18   :  { %p1142_p9 = pnand %p1141_p8, %p1135_p5 }
  0x8b   :  { %v48_v9 = vpop.permute.xlu0 %47 }
  0x8c   :  { %v50_v10 = vmul.f32 %v48_v9, %v43_v2  ;;  %v302_v11 = vmul.f32 %v299_v3, %v48_v9  ;;  %v532_v19 = vmul.f32 %v529_v4, %v48_v9  ;;  %v762_v22 = vmul.f32 %v759_v5, %v48_v9 }
  0x8d   :  { %v208_v50 = vpop.permute.xlu1 %207 }
  0x8f   :  { %v54_v12 = vpop.permute.xlu0 %53 }
  0x90   :  { %v56_v13 = vadd.f32 %v54_v12, %v50_v10  ;;  %v303_v14 = vadd.f32 %v302_v11, %v54_v12  ;;  %v533_v21 = vadd.f32 %v532_v19, %v54_v12  ;;  %v763_v24 = vadd.f32 %v762_v22, %v54_v12 }
  0x92   :  { %v57_v15 = vmax.f32 %v56_v13, 0.0  ;;  %v304_v18 = vmax.f32 %v303_v14, 0.0  ;;  %v534_v23 = vmax.f32 %v533_v21, 0.0  ;;  %v764_v25 = vmax.f32 %v763_v24, 0.0 }
  0x94   :  { %1044 = vmatpush3.msra.mxu0 %v57_v15  ;;  %1049 = vmatpush3.msra.mxu1 %v57_v15 }
  0x95   :  { %1046 = vmatmul.mubr.msk.f32.vlgmr.msra.gmra.mxu0 %vm58_vm1, %v38_v16  ;;  %1051 = vmatmul.mubr.msk.f32.vlgmr.msra.gmra.mxu1 %vm58_vm1, %v1006_v17 }
  0x96   :  { %1053 = vmatprep.subr.mxu0 %v1162_v7  ;;  %1058 = vmatprep.subr.mxu1 %v1162_v7 }
  0x97   :  { %1054 = vmatpush3.msra.mxu0 %v57_v15  ;;  %1059 = vmatpush3.msra.mxu1 %v304_v18 }
  0x98   :  { %1055 = vmatprep.mubr.msk.f32.mxu0 %vm1163_vm0, %v1162_v7  ;;  %1060 = vmatprep.mubr.msk.f32.mxu1 %vm1163_vm0, %v1162_v7 }
  0x99   :  { %1063 = vmatprep.subr.mxu0 %v1162_v7  ;;  %1068 = vmatprep.subr.mxu1 %v1162_v7 }
  0x9a   :  { %1056 = vmatmul.mubr.msk.f32.vlgmr.msra.gmra.mxu0 %vm58_vm1, %v1005_v20  ;;  %1061 = vmatmul.mubr.msk.f32.vlgmr.msra.gmra.mxu1 %vm58_vm1, %v38_v16 }
  0x9b   :  { %1064 = vmatpush3.msra.mxu0 %v304_v18  ;;  %1069 = vmatpush3.msra.mxu1 %v304_v18 }
  0x9c   :  { %1065 = vmatprep.mubr.msk.f32.mxu0 %vm1163_vm0, %v1162_v7  ;;  %1070 = vmatprep.mubr.msk.f32.mxu1 %vm1163_vm0, %v1162_v7 }
  0x9d   :  { %1073 = vmatprep.subr.mxu0 %v1162_v7  ;;  %1078 = vmatprep.subr.mxu1 %v1162_v7 }
  0x9e   :  { %1066 = vmatmul.mubr.msk.f32.vlgmr.msra.gmra.mxu0 %vm58_vm1, %v1006_v17  ;;  %1071 = vmatmul.mubr.msk.f32.vlgmr.msra.gmra.mxu1 %vm58_vm1, %v1005_v20 }
  0x9f   :  { %1074 = vmatpush3.msra.mxu0 %v534_v23  ;;  %1079 = vmatpush3.msra.mxu1 %v534_v23 }
  0xa0   :  { %1075 = vmatprep.mubr.msk.f32.mxu0 %vm1163_vm0, %v1162_v7  ;;  %1080 = vmatprep.mubr.msk.f32.mxu1 %vm1163_vm0, %v1162_v7 }
  0xa1   :  { %1083 = vmatprep.subr.mxu0 %v1162_v7  ;;  %1088 = vmatprep.subr.mxu1 %v1162_v7 }
  0xa2   :  { %1076 = vmatmul.mubr.msk.f32.vlgmr.msra.gmra.mxu0 %vm58_vm1, %v38_v16  ;;  %1081 = vmatmul.mubr.msk.f32.vlgmr.msra.gmra.mxu1 %vm58_vm1, %v1006_v17 }
  0xa3   :  { %1084 = vmatpush3.msra.mxu0 %v534_v23  ;;  %1089 = vmatpush3.msra.mxu1 %v764_v25 }
  0xa4   :  { %1085 = vmatprep.mubr.msk.f32.mxu0 %vm1163_vm0, %v1162_v7  ;;  %1090 = vmatprep.mubr.msk.f32.mxu1 %vm1163_vm0, %v1162_v7 }
  0xa5   :  { %1093 = vmatprep.subr.mxu0 %v1162_v7  ;;  %1098 = vmatprep.subr.mxu1 %v1162_v7 }
  0xa6   :  { %1086 = vmatmul.mubr.msk.f32.vlgmr.msra.gmra.mxu0 %vm58_vm1, %v1005_v20  ;;  %1091 = vmatmul.mubr.msk.f32.vlgmr.msra.gmra.mxu1 %vm58_vm1, %v38_v16 }
  0xa7   :  { %1094 = vmatpush3.msra.mxu0 %v764_v25  ;;  %1099 = vmatpush3.msra.mxu1 %v764_v25 }
  0xa8   :  { %1095 = vmatprep.mubr.msk.f32.mxu0 %vm1163_vm0, %v1162_v7  ;;  %1100 = vmatprep.mubr.msk.f32.mxu1 %vm1163_vm0, %v1162_v7 }
  0xaa   :  { %1096 = vmatmul.mubr.msk.f32.vlgmr.msra.gmra.mxu0 %vm58_vm1, %v1006_v17  ;;  %1101 = vmatmul.mubr.msk.f32.vlgmr.msra.gmra.mxu1 %vm58_vm1, %v1005_v20 }
 0x155   :  { %v128_v26 = vpop.f32.mrf.mxu0  ;;  %v201_v27 = vpop.f32.mrf.mxu1 }
 0x156   :  { %284 = vrot.lane.b32.xlu1 %v128_v26, %s1164_s3 }
 0x157   :  { %v1047_v28 = vpop.f32.mrf.mxu0  ;;  %v1052_v29 = vpop.f32.mrf.mxu1 }
 0x15a   :  { %v279_v30 = vpop.f32.mrf.mxu0  ;;  %v371_v31 = vpop.f32.mrf.mxu1  ;;  %291 = vrot.lane.b32.xlu1 %v201_v27, %s1165_s8 }
 0x15b   :  { %516 = vrot.lane.b32.xlu0 %v371_v31, %s1164_s3  ;;  %v280_v53 = vadd.f32 %v279_v30, %v208_v50 }
 0x15c   :  { %v1057_v32 = vpop.f32.mrf.mxu0  ;;  %v1062_v33 = vpop.f32.mrf.mxu1 }
 0x15e   :  { %v441_v34 = vpop.f32.mrf.mxu0  ;;  %v511_v35 = vpop.f32.mrf.mxu1 }
 0x15f   :  { %522 = vrot.lane.b32.xlu0 %v441_v34, %s1165_s8  ;;  %v512_v60 = vadd.f32 %v511_v35, %v208_v50 }
 0x160   :  { %v1067_v36 = vpop.f32.mrf.mxu0  ;;  %v1072_v37 = vpop.f32.mrf.mxu1 }
 0x162   :  { %v601_v38 = vpop.f32.mrf.mxu0  ;;  %v671_v39 = vpop.f32.mrf.mxu1 }
 0x163   :  { %746 = vrot.lane.b32.xlu1 %v601_v38, %s1164_s3 }
 0x164   :  { %v1077_v40 = vpop.f32.mrf.mxu0  ;;  %v1082_v41 = vpop.f32.mrf.mxu1 }
 0x166   :  { %v741_v42 = vpop.f32.mrf.mxu0  ;;  %v831_v43 = vpop.f32.mrf.mxu1 }
 0x167   :  { %752 = vrot.lane.b32.xlu1 %v671_v39, %s1165_s8  ;;  %976 = vrot.lane.b32.xlu0 %v831_v43, %s1164_s3  ;;  %v742_v3 = vadd.f32 %v741_v42, %v208_v50 }
 0x168   :  { %v1087_v44 = vpop.f32.mrf.mxu0  ;;  %v1092_v45 = vpop.f32.mrf.mxu1 }
 0x16a   :  { %v901_v46 = vpop.f32.mrf.mxu0  ;;  %v971_v47 = vpop.f32.mrf.mxu1 }
 0x16b   :  { %982 = vrot.lane.b32.xlu0 %v901_v46, %s1165_s8  ;;  %v972_v9 = vadd.f32 %v971_v47, %v208_v50 }
 0x16c   :  { %v1097_v48 = vpop.f32.mrf.mxu0  ;;  %v1102_v49 = vpop.f32.mrf.mxu1 }
 0x1c8   :  { %v285_v51 = vpop.permute.xlu1 %284 }
 0x1c9   :  { %v288_v52 = vsel %vm287_vm2, 0.0, %v285_v51 }
 0x1ca   :  { %v289_v54 = vadd.f32 %v288_v52, %v280_v53 }
 0x1cc   :  { %v292_v55 = vpop.permute.xlu1 %291 }
 0x1cd   :  { %v295_v56 = vsel %vm294_vm3, %v292_v55, 0.0  ;;  %v517_v57 = vpop.permute.xlu0 %516 }
 0x1ce   :  { %v296_v58 = vadd.f32 %v295_v56, %v289_v54  ;;  %v519_v59 = vsel %vm287_vm2, 0.0, %v517_v57 }
 0x1cf   :  { %v520_v61 = vadd.f32 %v519_v59, %v512_v60 }
 0x1d0   :  { %297 = vst [vmem:[#allocation5 + $0x8] sm:$0xff] %v296_v58 }
 0x1d1   :  { %v523_v62 = vpop.permute.xlu0 %522 }
 0x1d2   :  { %v525_v63 = vsel %vm294_vm3, %v523_v62, 0.0 }
 0x1d3   :  { %v526_v0 = vadd.f32 %v525_v63, %v520_v61 }
 0x1d5   :  { %527 = vst [vmem:[#allocation5 + $0x18] sm:$0xff] %v526_v0  ;;  %v747_v1 = vpop.permute.xlu1 %746 }
 0x1d6   :  { %v749_v2 = vsel %vm287_vm2, 0.0, %v747_v1 }
 0x1d7   :  { %v750_v4 = vadd.f32 %v749_v2, %v742_v3 }
 0x1d9   :  { %v753_v5 = vpop.permute.xlu1 %752  ;;  %v977_v6 = vpop.permute.xlu0 %976 }
 0x1da   :  { %v755_v7 = vsel %vm294_vm3, %v753_v5, 0.0  ;;  %v979_v8 = vsel %vm287_vm2, 0.0, %v977_v6 }
 0x1db   :  { %v756_v10 = vadd.f32 %v755_v7, %v750_v4  ;;  %v980_v11 = vadd.f32 %v979_v8, %v972_v9 }
 0x1dd   :  { %757 = vst [vmem:[#allocation5 + $0x28] sm:$0xff] %v756_v10  ;;  %v983_v12 = vpop.permute.xlu0 %982 }
 0x1de   :  { %v985_v13 = vsel %vm294_vm3, %v983_v12, 0.0 }
 0x1df   :  { %v986_v14 = vadd.f32 %v985_v13, %v980_v11 }
 0x1e1   :  { %987 = vst [vmem:[#allocation5 + $0x38] sm:$0xff] %v986_v14 }
 0x1e2   :  { %1145 = shalt.err (!%p1142_p9)
}
 0x1e3   :  { %999 = dma.vmem_to_hbm [thread:$0]  %s994_s10, 1024, %s1288_s5, [#allocation4], %s1159_s21, %s1159_s21, %s1160_s22  }
 0x1e4   :  { %1156 = dma.done.wait [#allocation4], 1024  }
 0x1e5   :  { %1157 = vsyncadd [#allocation4], 4294966272 }
 0x1e6   :  { %1003 = vsyncpa [#allocation3], 1 }
 0x1e7   :  { %1004 = vsyncpa [#allocation4], 1 }

</bundles_post_ra>
